<compile_context>
chip_gen: v6e
topology: v6e:2x2x1
jax: 0.10.0
libtpu: 0.0.40
codegen_flags: <defaults>
</compile_context>

<pallas_src>
import math
import jax
import jax.numpy as jnp
from jax.experimental import pallas as pl
from jax.experimental.pallas import tpu as pltpu


def _round_up(n, m):
    return ((n + m - 1) // m) * m


def _pad2(x, rows, cols):
    r, c = x.shape
    return jnp.pad(x, ((0, rows - r), (0, cols - c)))


# ----------------------------- fused kernel --------------------------------

def _make_fused_mlp_kernel(n_layers):
    """Kernel args: (x_ref, w0, b0, w1, b1, ..., w_{L-1}, b_{L-1}, o_ref)."""

    def kernel(x_ref, *refs):
        o_ref = refs[-1]
        h = x_ref[...]                          # bf16 (TB, F0_pad)
        for i in range(n_layers):
            w = refs[2 * i][...]                # bf16 (Fin_pad, Fout_pad)
            b = refs[2 * i + 1][...]            # f32  (1,      Fout_pad)
            # bf16 operands on the MXU, f32 accumulate; bias add in f32.
            y = jnp.dot(h, w, preferred_element_type=jnp.float32) + b
            if i < n_layers - 1:
                # ReLU on bf16 values: the bf16 cast is required for the next
                # matmul anyway; doing max() after it halves VALU bytes on
                # v6e/v7x and is legalized (just not faster) on v5e.
                h = jnp.maximum(y.astype(jnp.bfloat16), 0.0)
            else:
                # Exact sigmoid (output is 1 lane wide after slicing; EUP
                # savings from an approx reciprocal would be negligible and
                # calibrated probabilities matter more).
                h = 1.0 / (1.0 + jnp.exp(-y))
        o_ref[...] = h.astype(o_ref.dtype)

    return kernel


# ------------------------------- wrapper ------------------------------------

def _choose_batch_tile(B, max_tile=512):
    """Sublane-aligned batch tile minimizing padding waste; prefers >=2 grid
    steps (megacore sharding on v7x) for medium/large batches."""
    b8 = _round_up(max(B, 1), 8)
    if b8 <= 128:
        return b8                       # single small step, zero extra padding
    cands = [t for t in (128, 256, 512) if t <= max(max_tile, 128)]
    best_tb, best_key = None, None
    for tb in cands:
        steps = -(-b8 // tb)
        waste = steps * tb - b8
        key = (waste, tb)               # least padding, then smaller tile
        if best_key is None or key < best_key:
            best_tb, best_key = tb, key
    return best_tb


def mlp_forward(folded_params, x, *, max_batch_tile=512):
    """Run the fused MLP. `folded_params` = [(W_bf16_padded, b_f32_padded), ...].
    Returns the lane-padded output; caller slices [:B, :output_size]."""
    B, _ = x.shape
    f_in_pad = folded_params[0][0].shape[0]
    out_pad = folded_params[-1][0].shape[1]
    n_layers = len(folded_params)

    tb = _choose_batch_tile(B, max_batch_tile)
    b_pad = _round_up(_round_up(B, 8), tb)
    # bf16 activation input: halves the per-step HBM->VMEM x-tile DMA and
    # drops the in-kernel cast before the first matmul.
    x_p = _pad2(x.astype(jnp.float32), b_pad, f_in_pad).astype(jnp.bfloat16)

    operands = [x_p]
    for w, b in folded_params:
        operands += [w, b]

    # ---- explicit VMEM budget (v7x only has 64 MiB/TC) ----
    w_bytes = sum(int(w.size) * w.dtype.itemsize + int(b.size) * b.dtype.itemsize
                  for w, b in folded_params)
    widest = max(w.shape[1] for w, _ in folded_params)
    x_tile_bytes = tb * f_in_pad * 2                 # bf16
    out_tile_bytes = tb * out_pad * 4                # f32
    act_bytes = tb * widest * 4 * 2                  # live f32 accum + bf16 acts
    vmem_needed = 2 * (x_tile_bytes + out_tile_bytes) + w_bytes + act_bytes
    vmem_limit = int(min(max(vmem_needed + (2 << 20), 8 << 20), 64 << 20))
    # TODO(synk): if vmem_needed ever exceeds ~48 MiB (very wide hidden layers
    # on v7x), stream the largest layer's weights over a K ("arbitrary") grid
    # axis with a pl.when-initialized accumulator instead of holding all
    # weights resident.

    flops = 2 * b_pad * sum(w.shape[0] * w.shape[1] for w, _ in folded_params)
    bytes_accessed = int(x_p.size) * 2 + b_pad * out_pad * 4 + w_bytes
    cost = pl.CostEstimate(flops=flops,
                           transcendentals=b_pad * out_pad,
                           bytes_accessed=bytes_accessed)

    def _call(single_buffer_weights):
        wmode = ({"pipeline_mode": pl.Buffered(1)}
                 if single_buffer_weights else {})
        in_specs = [pl.BlockSpec((tb, f_in_pad), lambda i: (i, 0))]
        for w, b in folded_params:
            # Constant index_map -> resident across the whole grid; single
            # buffering avoids paying 2x VMEM for arrays fetched only once.
            in_specs.append(pl.BlockSpec(w.shape, lambda i: (0, 0), **wmode))
            in_specs.append(pl.BlockSpec(b.shape, lambda i: (0, 0), **wmode))
        return pl.pallas_call(
            _make_fused_mlp_kernel(n_layers),
            out_shape=jax.ShapeDtypeStruct((b_pad, out_pad), jnp.float32),
            grid=(b_pad // tb,),
            in_specs=in_specs,
            out_specs=pl.BlockSpec((tb, out_pad), lambda i: (i, 0)),
            compiler_params=pltpu.CompilerParams(
                dimension_semantics=("parallel",),
                vmem_limit_bytes=vmem_limit),
            cost_estimate=cost,
        )(*operands)

    try:
        return _call(True)
    except Exception:
        # Fallback for Pallas builds that reject Buffered(1): identical
        # results, only the resident-weight VMEM footprint doubles.
        return _call(False)


# ------------------------------ parameters ----------------------------------

def init_mlp_params(key, input_size, hidden_sizes, output_size=1):
    """Raw params mirroring nn.Linear init (U(-1/sqrt(fan_in), 1/sqrt(fan_in)))
    and nn.BatchNorm1d defaults (gamma=1, beta=0, running_mean=0, running_var=1)."""
    params = []
    prev = input_size
    for h in hidden_sizes:
        key, kw, kb = jax.random.split(key, 3)
        bound = 1.0 / math.sqrt(prev)
        w = jax.random.uniform(kw, (prev, h), jnp.float32, -bound, bound)
        b = jax.random.uniform(kb, (1, h), jnp.float32, -bound, bound)
        gamma = jnp.ones((1, h), jnp.float32)
        beta = jnp.zeros((1, h), jnp.float32)
        running_mean = jnp.zeros((1, h), jnp.float32)
        running_var = jnp.ones((1, h), jnp.float32)
        params.append(("hidden", w, b, gamma, beta, running_mean, running_var, 1e-5))
        prev = h
    key, kw, kb = jax.random.split(key, 3)
    bound = 1.0 / math.sqrt(prev)
    w = jax.random.uniform(kw, (prev, output_size), jnp.float32, -bound, bound)
    b = jax.random.uniform(kb, (1, output_size), jnp.float32, -bound, bound)
    params.append(("output", w, b))
    return params


def fold_and_pad_params(raw_params, input_size):
    """Fold eval-mode BatchNorm into the Linears and zero-pad every feature dim
    up to a multiple of 128 lanes (lane-dense tiles, no masked stores).

    BN(relu(xW+b)) = relu(xW+b)*scale + shift, scale = gamma/sqrt(var+eps).
    relu(y)*scale == relu(y*scale) requires scale > 0 (asserted below); the
    additive shift folds into the NEXT layer's bias via shift @ W_next.
    Weights are stored bf16 (MXU operands, half the DMA); biases stay f32."""
    folded = []
    shift_prev = jnp.zeros((1, input_size), jnp.float32)
    for layer in raw_params:
        if layer[0] == "hidden":
            _, w, b, gamma, beta, mean, var, eps = layer
            scale = gamma * jax.lax.rsqrt(var + eps)
            # Guard the ReLU/scale commutation (holds for default gamma = 1).
            assert bool(jnp.all(scale > 0)), "BN fold requires gamma*rsqrt(var+eps) > 0"
            shift = beta - mean * scale
            w_eff = w * scale
            b_eff = b * scale + shift_prev @ w_eff
            shift_prev = shift
        else:
            _, w, b = layer
            w_eff = w
            b_eff = b + shift_prev @ w
        fin_p = _round_up(w_eff.shape[0], 128)
        fout_p = _round_up(w_eff.shape[1], 128)
        folded.append((_pad2(w_eff, fin_p, fout_p).astype(jnp.bfloat16),
                       _pad2(b_eff, 1, fout_p).astype(jnp.float32)))
    return folded


# pure-JAX f32 reference with the original per-layer (eval-mode) semantics
def mlp_forward_ref(raw_params, x):
    h = x
    for layer in raw_params:
        if layer[0] == "hidden":
            _, w, b, gamma, beta, mean, var, eps = layer
            h = jnp.maximum(h @ w + b, 0.0)
            h = gamma * (h - mean) / jnp.sqrt(var + eps) + beta
            # Dropout(p) in eval mode is the identity.
        else:
            _, w, b = layer
            h = jax.nn.sigmoid(h @ w + b)
    return h


if __name__ == "__main__":
    key = jax.random.PRNGKey(0)
    key, kx = jax.random.split(key)

    batch = 8
    input_size = 32
    hidden_sizes = [64, 32]
    output_size = 1

    x = jax.random.normal(kx, (batch, input_size), jnp.float32)
    raw_params = init_mlp_params(key, input_size, hidden_sizes, output_size)
    folded_params = fold_and_pad_params(raw_params, input_size)

    out_padded = mlp_forward(folded_params, x)
    out_padded = jax.block_until_ready(out_padded)
    out = out_padded[:batch, :output_size]

    ref = mlp_forward_ref(raw_params, x)
    assert out.shape == (batch, output_size)
    # bf16 matmul operands/activations -> loosened tolerance vs f32 reference
    assert jnp.allclose(out, ref, atol=1e-2, rtol=1e-2), (
        f"max abs err = {float(jnp.max(jnp.abs(out - ref)))}")

    print("KERNEL_OK")
</pallas_src>

<mosaic_0001>
module attributes {stable_mosaic.version = 11 : i64} {
  func.func @kernel(%arg0: i32, %arg1: memref<8x128xbf16, #tpu.memory_space<vmem>>, %arg2: memref<128x128xbf16, #tpu.memory_space<vmem>>, %arg3: memref<1x128xf32, #tpu.memory_space<vmem>>, %arg4: memref<128x128xbf16, #tpu.memory_space<vmem>>, %arg5: memref<1x128xf32, #tpu.memory_space<vmem>>, %arg6: memref<128x128xbf16, #tpu.memory_space<vmem>>, %arg7: memref<1x128xf32, #tpu.memory_space<vmem>>, %arg8: memref<8x128xf32, #tpu.memory_space<vmem>>) attributes {dimension_semantics = [#tpu.dimension_semantics<parallel>], iteration_bounds = array<i64: 1>, scalar_prefetch = 0 : i64, scratch_operands = 0 : i64, tpu.core_type = #tpu.core_type<tc>, window_params = [{transform_indices = @transform_0, window_bounds = array<i64: 8, 128>}, {pipeline_mode = #tpu.pipeline_mode<synchronous>, transform_indices = @transform_1, window_bounds = array<i64: 128, 128>}, {pipeline_mode = #tpu.pipeline_mode<synchronous>, transform_indices = @transform_2, window_bounds = array<i64: 1, 128>}, {pipeline_mode = #tpu.pipeline_mode<synchronous>, transform_indices = @transform_3, window_bounds = array<i64: 128, 128>}, {pipeline_mode = #tpu.pipeline_mode<synchronous>, transform_indices = @transform_4, window_bounds = array<i64: 1, 128>}, {pipeline_mode = #tpu.pipeline_mode<synchronous>, transform_indices = @transform_5, window_bounds = array<i64: 128, 128>}, {pipeline_mode = #tpu.pipeline_mode<synchronous>, transform_indices = @transform_6, window_bounds = array<i64: 1, 128>}, {transform_indices = @transform_7, window_bounds = array<i64: 8, 128>}]} {
    %c0 = arith.constant 0 : index
    %c0_0 = arith.constant 0 : index
    %0 = vector.load %arg1[%c0, %c0_0] : memref<8x128xbf16, #tpu.memory_space<vmem>>, vector<8x128xbf16>
    %c0_1 = arith.constant 0 : index
    %c0_2 = arith.constant 0 : index
    %1 = vector.load %arg2[%c0_1, %c0_2] : memref<128x128xbf16, #tpu.memory_space<vmem>>, vector<128x128xbf16>
    %c0_3 = arith.constant 0 : index
    %c0_4 = arith.constant 0 : index
    %2 = vector.load %arg3[%c0_3, %c0_4] : memref<1x128xf32, #tpu.memory_space<vmem>>, vector<1x128xf32>
    %cst = arith.constant dense<0.000000e+00> : vector<8x128xf32>
    %3 = tpu.matmul %0, %1, %cst {dimension_numbers = #tpu.dot_dimension_numbers<[1], [0], [0], [1], [0, 0, 1, 1], [], []>} : vector<8x128xbf16>, vector<128x128xbf16>, vector<8x128xf32> -> vector<8x128xf32>
    %4 = vector.broadcast %2 : vector<1x128xf32> to vector<8x128xf32>
    %5 = arith.addf %3, %4 : vector<8x128xf32>
    %6 = arith.truncf %5 : vector<8x128xf32> to vector<8x128xbf16>
    %cst_5 = arith.constant 0.000000e+00 : bf16
    %7 = vector.broadcast %cst_5 : bf16 to vector<8x128xbf16>
    %8 = arith.maximumf %6, %7 : vector<8x128xbf16>
    %c0_6 = arith.constant 0 : index
    %c0_7 = arith.constant 0 : index
    %9 = vector.load %arg4[%c0_6, %c0_7] : memref<128x128xbf16, #tpu.memory_space<vmem>>, vector<128x128xbf16>
    %c0_8 = arith.constant 0 : index
    %c0_9 = arith.constant 0 : index
    %10 = vector.load %arg5[%c0_8, %c0_9] : memref<1x128xf32, #tpu.memory_space<vmem>>, vector<1x128xf32>
    %cst_10 = arith.constant dense<0.000000e+00> : vector<8x128xf32>
    %11 = tpu.matmul %8, %9, %cst_10 {dimension_numbers = #tpu.dot_dimension_numbers<[1], [0], [0], [1], [0, 0, 1, 1], [], []>} : vector<8x128xbf16>, vector<128x128xbf16>, vector<8x128xf32> -> vector<8x128xf32>
    %12 = vector.broadcast %10 : vector<1x128xf32> to vector<8x128xf32>
    %13 = arith.addf %11, %12 : vector<8x128xf32>
    %14 = arith.truncf %13 : vector<8x128xf32> to vector<8x128xbf16>
    %cst_11 = arith.constant 0.000000e+00 : bf16
    %15 = vector.broadcast %cst_11 : bf16 to vector<8x128xbf16>
    %16 = arith.maximumf %14, %15 : vector<8x128xbf16>
    %c0_12 = arith.constant 0 : index
    %c0_13 = arith.constant 0 : index
    %17 = vector.load %arg6[%c0_12, %c0_13] : memref<128x128xbf16, #tpu.memory_space<vmem>>, vector<128x128xbf16>
    %c0_14 = arith.constant 0 : index
    %c0_15 = arith.constant 0 : index
    %18 = vector.load %arg7[%c0_14, %c0_15] : memref<1x128xf32, #tpu.memory_space<vmem>>, vector<1x128xf32>
    %cst_16 = arith.constant dense<0.000000e+00> : vector<8x128xf32>
    %19 = tpu.matmul %16, %17, %cst_16 {dimension_numbers = #tpu.dot_dimension_numbers<[1], [0], [0], [1], [0, 0, 1, 1], [], []>} : vector<8x128xbf16>, vector<128x128xbf16>, vector<8x128xf32> -> vector<8x128xf32>
    %20 = vector.broadcast %18 : vector<1x128xf32> to vector<8x128xf32>
    %21 = arith.addf %19, %20 : vector<8x128xf32>
    %cst_17 = arith.constant 0.000000e+00 : f32
    %22 = vector.broadcast %cst_17 : f32 to vector<8x128xf32>
    %23 = arith.subf %22, %21 : vector<8x128xf32>
    %24 = math.exp %23 : vector<8x128xf32>
    %cst_18 = arith.constant 1.000000e+00 : f32
    %25 = vector.broadcast %cst_18 : f32 to vector<8x128xf32>
    %26 = arith.addf %25, %24 : vector<8x128xf32>
    %cst_19 = arith.constant 1.000000e+00 : f32
    %27 = vector.broadcast %cst_19 : f32 to vector<8x128xf32>
    %28 = arith.divf %27, %26 : vector<8x128xf32>
    %c0_20 = arith.constant 0 : index
    %c0_21 = arith.constant 0 : index
    %29 = vector.load %arg8[%c0_20, %c0_21] : memref<8x128xf32, #tpu.memory_space<vmem>>, vector<8x128xf32>
    tpu.vector_store %arg8[%c0_20, %c0_21], %28 {strides = array<i32>} : memref<8x128xf32, #tpu.memory_space<vmem>>, vector<8x128xf32>,
    return
  }
  func.func @transform_0(%arg0: i32) -> (i32, i32) {
    %c0_i32 = arith.constant 0 : i32
    %c0_i32_0 = arith.constant 0 : i32
    return %arg0, %c0_i32 : i32, i32
  }
  func.func @transform_1(%arg0: i32) -> (i32, i32) {
    %c0_i32 = arith.constant 0 : i32
    %c0_i32_0 = arith.constant 0 : i32
    %c0_i32_1 = arith.constant 0 : i32
    return %c0_i32, %c0_i32_0 : i32, i32
  }
  func.func @transform_2(%arg0: i32) -> (i32, i32) {
    %c0_i32 = arith.constant 0 : i32
    %c0_i32_0 = arith.constant 0 : i32
    %c0_i32_1 = arith.constant 0 : i32
    return %c0_i32, %c0_i32_0 : i32, i32
  }
  func.func @transform_3(%arg0: i32) -> (i32, i32) {
    %c0_i32 = arith.constant 0 : i32
    %c0_i32_0 = arith.constant 0 : i32
    %c0_i32_1 = arith.constant 0 : i32
    return %c0_i32, %c0_i32_0 : i32, i32
  }
  func.func @transform_4(%arg0: i32) -> (i32, i32) {
    %c0_i32 = arith.constant 0 : i32
    %c0_i32_0 = arith.constant 0 : i32
    %c0_i32_1 = arith.constant 0 : i32
    return %c0_i32, %c0_i32_0 : i32, i32
  }
  func.func @transform_5(%arg0: i32) -> (i32, i32) {
    %c0_i32 = arith.constant 0 : i32
    %c0_i32_0 = arith.constant 0 : i32
    %c0_i32_1 = arith.constant 0 : i32
    return %c0_i32, %c0_i32_0 : i32, i32
  }
  func.func @transform_6(%arg0: i32) -> (i32, i32) {
    %c0_i32 = arith.constant 0 : i32
    %c0_i32_0 = arith.constant 0 : i32
    %c0_i32_1 = arith.constant 0 : i32
    return %c0_i32, %c0_i32_0 : i32, i32
  }
  func.func @transform_7(%arg0: i32) -> (i32, i32) {
    %c0_i32 = arith.constant 0 : i32
    %c0_i32_0 = arith.constant 0 : i32
    return %arg0, %c0_i32 : i32, i32
  }
}

module attributes {stable_mosaic.version = 11 : i64} {
  func.func @kernel(%arg0: i32, %arg1: memref<8x128xbf16, #tpu.memory_space<vmem>>, %arg2: memref<128x128xbf16, #tpu.memory_space<vmem>>, %arg3: memref<1x128xf32, #tpu.memory_space<vmem>>, %arg4: memref<128x128xbf16, #tpu.memory_space<vmem>>, %arg5: memref<1x128xf32, #tpu.memory_space<vmem>>, %arg6: memref<128x128xbf16, #tpu.memory_space<vmem>>, %arg7: memref<1x128xf32, #tpu.memory_space<vmem>>, %arg8: memref<8x128xf32, #tpu.memory_space<vmem>>) attributes {dimension_semantics = [#tpu.dimension_semantics<parallel>], iteration_bounds = array<i64: 1>, scalar_prefetch = 0 : i64, scratch_operands = 0 : i64, tpu.core_type = #tpu.core_type<tc>, window_params = [{transform_indices = @transform_0, window_bounds = array<i64: 8, 128>}, {pipeline_mode = #tpu.pipeline_mode<synchronous>, transform_indices = @transform_1, window_bounds = array<i64: 128, 128>}, {pipeline_mode = #tpu.pipeline_mode<synchronous>, transform_indices = @transform_2, window_bounds = array<i64: 1, 128>}, {pipeline_mode = #tpu.pipeline_mode<synchronous>, transform_indices = @transform_3, window_bounds = array<i64: 128, 128>}, {pipeline_mode = #tpu.pipeline_mode<synchronous>, transform_indices = @transform_4, window_bounds = array<i64: 1, 128>}, {pipeline_mode = #tpu.pipeline_mode<synchronous>, transform_indices = @transform_5, window_bounds = array<i64: 128, 128>}, {pipeline_mode = #tpu.pipeline_mode<synchronous>, transform_indices = @transform_6, window_bounds = array<i64: 1, 128>}, {transform_indices = @transform_7, window_bounds = array<i64: 8, 128>}]} {
    %c0 = arith.constant 0 : index
    %c0_0 = arith.constant 0 : index
    %0 = vector.load %arg1[%c0, %c0_0] : memref<8x128xbf16, #tpu.memory_space<vmem>>, vector<8x128xbf16>
    %c0_1 = arith.constant 0 : index
    %c0_2 = arith.constant 0 : index
    %1 = vector.load %arg2[%c0_1, %c0_2] : memref<128x128xbf16, #tpu.memory_space<vmem>>, vector<128x128xbf16>
    %c0_3 = arith.constant 0 : index
    %c0_4 = arith.constant 0 : index
    %2 = vector.load %arg3[%c0_3, %c0_4] : memref<1x128xf32, #tpu.memory_space<vmem>>, vector<1x128xf32>
    %cst = arith.constant dense<0.000000e+00> : vector<8x128xf32>
    %3 = tpu.matmul %0, %1, %cst {dimension_numbers = #tpu.dot_dimension_numbers<[1], [0], [0], [1], [0, 0, 1, 1], [], []>} : vector<8x128xbf16>, vector<128x128xbf16>, vector<8x128xf32> -> vector<8x128xf32>
    %4 = vector.broadcast %2 : vector<1x128xf32> to vector<8x128xf32>
    %5 = arith.addf %3, %4 : vector<8x128xf32>
    %6 = arith.truncf %5 : vector<8x128xf32> to vector<8x128xbf16>
    %cst_5 = arith.constant 0.000000e+00 : bf16
    %7 = vector.broadcast %cst_5 : bf16 to vector<8x128xbf16>
    %8 = arith.maximumf %6, %7 : vector<8x128xbf16>
    %c0_6 = arith.constant 0 : index
    %c0_7 = arith.constant 0 : index
    %9 = vector.load %arg4[%c0_6, %c0_7] : memref<128x128xbf16, #tpu.memory_space<vmem>>, vector<128x128xbf16>
    %c0_8 = arith.constant 0 : index
    %c0_9 = arith.constant 0 : index
    %10 = vector.load %arg5[%c0_8, %c0_9] : memref<1x128xf32, #tpu.memory_space<vmem>>, vector<1x128xf32>
    %cst_10 = arith.constant dense<0.000000e+00> : vector<8x128xf32>
    %11 = tpu.matmul %8, %9, %cst_10 {dimension_numbers = #tpu.dot_dimension_numbers<[1], [0], [0], [1], [0, 0, 1, 1], [], []>} : vector<8x128xbf16>, vector<128x128xbf16>, vector<8x128xf32> -> vector<8x128xf32>
    %12 = vector.broadcast %10 : vector<1x128xf32> to vector<8x128xf32>
    %13 = arith.addf %11, %12 : vector<8x128xf32>
    %14 = arith.truncf %13 : vector<8x128xf32> to vector<8x128xbf16>
    %cst_11 = arith.constant 0.000000e+00 : bf16
    %15 = vector.broadcast %cst_11 : bf16 to vector<8x128xbf16>
    %16 = arith.maximumf %14, %15 : vector<8x128xbf16>
    %c0_12 = arith.constant 0 : index
    %c0_13 = arith.constant 0 : index
    %17 = vector.load %arg6[%c0_12, %c0_13] : memref<128x128xbf16, #tpu.memory_space<vmem>>, vector<128x128xbf16>
    %c0_14 = arith.constant 0 : index
    %c0_15 = arith.constant 0 : index
    %18 = vector.load %arg7[%c0_14, %c0_15] : memref<1x128xf32, #tpu.memory_space<vmem>>, vector<1x128xf32>
    %cst_16 = arith.constant dense<0.000000e+00> : vector<8x128xf32>
    %19 = tpu.matmul %16, %17, %cst_16 {dimension_numbers = #tpu.dot_dimension_numbers<[1], [0], [0], [1], [0, 0, 1, 1], [], []>} : vector<8x128xbf16>, vector<128x128xbf16>, vector<8x128xf32> -> vector<8x128xf32>
    %20 = vector.broadcast %18 : vector<1x128xf32> to vector<8x128xf32>
    %21 = arith.addf %19, %20 : vector<8x128xf32>
    %cst_17 = arith.constant 0.000000e+00 : f32
    %22 = vector.broadcast %cst_17 : f32 to vector<8x128xf32>
    %23 = arith.subf %22, %21 : vector<8x128xf32>
    %24 = math.exp %23 : vector<8x128xf32>
    %cst_18 = arith.constant 1.000000e+00 : f32
    %25 = vector.broadcast %cst_18 : f32 to vector<8x128xf32>
    %26 = arith.addf %25, %24 : vector<8x128xf32>
    %cst_19 = arith.constant 1.000000e+00 : f32
    %27 = vector.broadcast %cst_19 : f32 to vector<8x128xf32>
    %28 = arith.divf %27, %26 : vector<8x128xf32>
    %c0_20 = arith.constant 0 : index
    %c0_21 = arith.constant 0 : index
    %29 = vector.load %arg8[%c0_20, %c0_21] : memref<8x128xf32, #tpu.memory_space<vmem>>, vector<8x128xf32>
    tpu.vector_store %arg8[%c0_20, %c0_21], %28 {strides = array<i32>} : memref<8x128xf32, #tpu.memory_space<vmem>>, vector<8x128xf32>,
    return
  }
  func.func @transform_0(%arg0: i32) -> (i32, i32) {
    %c0_i32 = arith.constant 0 : i32
    %c0_i32_0 = arith.constant 0 : i32
    return %arg0, %c0_i32 : i32, i32
  }
  func.func @transform_1(%arg0: i32) -> (i32, i32) {
    %c0_i32 = arith.constant 0 : i32
    %c0_i32_0 = arith.constant 0 : i32
    %c0_i32_1 = arith.constant 0 : i32
    return %c0_i32, %c0_i32_0 : i32, i32
  }
  func.func @transform_2(%arg0: i32) -> (i32, i32) {
    %c0_i32 = arith.constant 0 : i32
    %c0_i32_0 = arith.constant 0 : i32
    %c0_i32_1 = arith.constant 0 : i32
    return %c0_i32, %c0_i32_0 : i32, i32
  }
  func.func @transform_3(%arg0: i32) -> (i32, i32) {
    %c0_i32 = arith.constant 0 : i32
    %c0_i32_0 = arith.constant 0 : i32
    %c0_i32_1 = arith.constant 0 : i32
    return %c0_i32, %c0_i32_0 : i32, i32
  }
  func.func @transform_4(%arg0: i32) -> (i32, i32) {
    %c0_i32 = arith.constant 0 : i32
    %c0_i32_0 = arith.constant 0 : i32
    %c0_i32_1 = arith.constant 0 : i32
    return %c0_i32, %c0_i32_0 : i32, i32
  }
  func.func @transform_5(%arg0: i32) -> (i32, i32) {
    %c0_i32 = arith.constant 0 : i32
    %c0_i32_0 = arith.constant 0 : i32
    %c0_i32_1 = arith.constant 0 : i32
    return %c0_i32, %c0_i32_0 : i32, i32
  }
  func.func @transform_6(%arg0: i32) -> (i32, i32) {
    %c0_i32 = arith.constant 0 : i32
    %c0_i32_0 = arith.constant 0 : i32
    %c0_i32_1 = arith.constant 0 : i32
    return %c0_i32, %c0_i32_0 : i32, i32
  }
  func.func @transform_7(%arg0: i32) -> (i32, i32) {
    %c0_i32 = arith.constant 0 : i32
    %c0_i32_0 = arith.constant 0 : i32
    return %arg0, %c0_i32 : i32, i32
  }
}

</mosaic_0001>

<bundles_post_ra>
// kernel: tpu_custom_call.1
= control target key start
LH: loop header
LB: loop body
LE: loop exit
PB: predicated region body
PF: predicated region fallthrough
CT: control target
= control target key end

     0   :  { %12 = vsyncpa [#allocation3], 0  ;;  %s816_s0 = inlined_call_operand.hbm [shape: bf16[8,128], index: 0, kind: input, shape index: {}]   ;;  %s817_s1 = inlined_call_operand.hbm [shape: bf16[128,128], index: 1, kind: input, shape index: {}]   ;;  %s818_s2 = inlined_call_operand.vmem [shape: f32[1,128], index: 2, kind: input, shape index: {}]   ;;  %s819_s3 = inlined_call_operand.hbm [shape: bf16[128,128], index: 3, kind: input, shape index: {}]   ;;  %s820_s4 = inlined_call_operand.vmem [shape: f32[1,128], index: 4, kind: input, shape index: {}]   ;;  %s821_s5 = inlined_call_operand.hbm [shape: bf16[128,128], index: 5, kind: input, shape index: {}]   ;;  %s822_s6 = inlined_call_operand.vmem [shape: f32[1,128], index: 6, kind: input, shape index: {}]   ;;  %s823_s7 = inlined_call_operand.hbm [shape: f32[8,128], index: 7, kind: output, shape index: {}]  }
   0x1   :  { %13 = vsyncpa [#allocation6], 0 }
   0x2   :  { %14 = vsyncpa [#allocation9], 0 }
   0x3   :  { %15 = vsyncpa [#allocation4], 0  ;;  %s703_s24 = smov [#allocation5]  }
   0x4   :  { %s31_s25 = sshll.u32 %s703_s24, 4  ;;  %s32_s25 = int_to_ptr.vmem [resolvable:$true] %s31_s25 }
   0x5   :  { %s603_s26 = scalar_lea.vmem %s32_s25, 1024  ;;  %p608_p1 = scmp.lt.s32.totalorder %s32_s25, %s32_s25 }
   0x6   :  { %p604_p0 = scmp.ne.s32.totalorder %s32_s25, %s603_s26  ;;  %p609_p2 = scmp.lt.s32.totalorder %s603_s26, %s603_s26 }
   0x8   :  { %p610_p3 = por %p609_p2, %p608_p1 }
   0xa   :  { %p611_p4 = pnand %p610_p3, %p604_p0 }
   0xc   :  { %614 = shalt.err (!%p611_p4)
}
   0xd   :  { %s704_s27 = smov 64   ;;  %s705_s28 = smov 4  }
   0xe   :  { %37 = dma.hbm_to_vmem [thread:$0]  %s817_s1, 1024, %s32_s25, [#allocation6], %s704_s27, %s704_s27, %s705_s28  }
   0xf   :  { %s706_s8 = smov [#allocation2]   ;;  %s707_s10 = smov [#allocation7]  }
  0x10   :  { %s22_s9 = sshll.u32 %s706_s8, 4  ;;  %s45_s11 = sshll.u32 %s707_s10, 4  ;;  %s23_s9 = int_to_ptr.vmem [resolvable:$true] %s22_s9  ;;  %s46_s11 = int_to_ptr.vmem [resolvable:$true] %s45_s11 }
  0x11   :  { %s623_s12 = scalar_lea.vmem %s23_s9, 64  ;;  %p628_p6 = scmp.lt.s32.totalorder %s23_s9, %s23_s9 }
  0x12   :  { %p624_p5 = scmp.ne.s32.totalorder %s23_s9, %s623_s12  ;;  %p629_p7 = scmp.lt.s32.totalorder %s623_s12, %s623_s12 }
  0x14   :  { %p630_p8 = por %p629_p7, %p628_p6 }
  0x16   :  { %p631_p9 = pnand %p630_p8, %p624_p5 }
  0x18   :  { %634 = shalt.err (!%p631_p9)
}
  0x19   :  { %25 = dma.hbm_to_vmem [thread:$0]  %s816_s0, 64, %s23_s9, [#allocation3]  }
  0x1a   :  { %s643_s15 = scalar_lea.vmem %s46_s11, 1024  ;;  %p648_p11 = scmp.lt.s32.totalorder %s46_s11, %s46_s11 }
  0x1b   :  { %p644_p10 = scmp.ne.s32.totalorder %s46_s11, %s643_s15  ;;  %p649_p12 = scmp.lt.s32.totalorder %s643_s15, %s643_s15 }
  0x1d   :  { %p650_p13 = por %p649_p12, %p648_p11 }
  0x1f   :  { %p651_p0 = pnand %p650_p13, %p644_p10 }
  0x21   :  { %654 = shalt.err (!%p651_p0)
}
  0x22   :  { %51 = dma.hbm_to_vmem [thread:$0]  %s819_s3, 1024, %s46_s11, [#allocation6], %s704_s27, %s704_s27, %s705_s28  }
  0x23   :  { %s708_s17 = smov [#allocation8]  }
  0x24   :  { %s59_s18 = sshll.u32 %s708_s17, 4  ;;  %s60_s18 = int_to_ptr.vmem [resolvable:$true] %s59_s18 }
  0x25   :  { %s663_s19 = scalar_lea.vmem %s60_s18, 1024  ;;  %p668_p2 = scmp.lt.s32.totalorder %s60_s18, %s60_s18 }
  0x26   :  { %p664_p1 = scmp.ne.s32.totalorder %s60_s18, %s663_s19  ;;  %p669_p3 = scmp.lt.s32.totalorder %s663_s19, %s663_s19 }
  0x28   :  { %p670_p4 = por %p669_p3, %p668_p2 }
  0x2a   :  { %p671_p5 = pnand %p670_p4, %p664_p1 }
  0x2c   :  { %674 = shalt.err (!%p671_p5)
}
  0x2d   :  { %65 = dma.hbm_to_vmem [thread:$0]  %s821_s5, 1024, %s60_s18, [#allocation9], %s704_s27, %s704_s27, %s705_s28  }
  0x2e   :  { %695 = dma.done.wait [#allocation3], 64  }
  0x2f   :  { %696 = vsyncadd [#allocation3], 4294967232 }
  0x30   :  { %697 = dma.done.wait [#allocation6], 2048  }
  0x31   :  { %698 = vsyncadd [#allocation6], 4294965248 }
  0x32   :  { %699 = dma.done.wait [#allocation9], 1024  }
  0x33   :  { %700 = vsyncadd [#allocation9], 4294966272  ;;  %v709_v0 = vmov 0.0   ;;  %vm710_vm0 = vmmov 0   ;;  %v567_v1 = vld [vmem:[#allocation5 + $0x38] sm:$0xff]   ;;  %v568_v2 = vld [vmem:[#allocation5 + $0x30] sm:$0xff]  }
  0x34   :  { %497 = vmatprep.subr.bf16.mxu0 %v709_v0  ;;  %513 = vmatprep.mubr.msk.bf16.mxu0 %vm710_vm0, %v709_v0  ;;  %v569_v3 = vld [vmem:[#allocation5 + $0x28] sm:$0xff]   ;;  %v575_v4 = vld [vmem:[#allocation7 + $0x38] sm:$0xff]   ;;  %v570_v5 = vld [vmem:[#allocation5 + $0x20] sm:$0xff]   ;;  %v711_v30 = vmov 0  }
  0x35   :  { %517 = vmatprep.subr.bf16.mxu1 %v709_v0  ;;  %533 = vmatprep.mubr.msk.bf16.mxu1 %vm710_vm0, %v709_v0  ;;  %v576_v6 = vld [vmem:[#allocation7 + $0x30] sm:$0xff]   ;;  %v571_v7 = vld [vmem:[#allocation5 + $0x18] sm:$0xff]   ;;  %v577_v8 = vld [vmem:[#allocation7 + $0x28] sm:$0xff]  }
  0x36   :  { %498 = vmatpush3.bf16.msra.mxu0 %v567_v1  ;;  %518 = vmatpush3.bf16.msra.mxu1 %v575_v4  ;;  %v572_v9 = vld [vmem:[#allocation5 + $0x10] sm:$0xff]   ;;  %v578_v10 = vld [vmem:[#allocation7 + $0x20] sm:$0xff]   ;;  %v573_v11 = vld [vmem:[#allocation5 + $0x8] sm:$0xff]  }
  0x37   :  { %499 = vmatprep.subr.bf16.mxu0 %v709_v0  ;;  %519 = vmatprep.subr.bf16.mxu1 %v709_v0  ;;  %v579_v12 = vld [vmem:[#allocation7 + $0x18] sm:$0xff]   ;;  %v574_v13 = vld [vmem:[#allocation5] sm:$0xff]   ;;  %v580_v14 = vld [vmem:[#allocation7 + $0x10] sm:$0xff]  }
  0x38   :  { %v81_v15 = vld [vmem:[#allocation2] sm:$0xf]  ;;  %v581_v16 = vld [vmem:[#allocation7 + $0x8] sm:$0xff]   ;;  %v582_v17 = vld [vmem:[#allocation7] sm:$0xff]  }
  0x39   :  { %v583_v18 = vld [vmem:[#allocation8 + $0x38] sm:$0xff]   ;;  %v584_v19 = vld [vmem:[#allocation8 + $0x30] sm:$0xff]   ;;  %v585_v20 = vld [vmem:[#allocation8 + $0x28] sm:$0xff]  }
  0x3a   :  { %500 = vmatpush3.bf16.msra.mxu0 %v568_v2  ;;  %520 = vmatpush3.bf16.msra.mxu1 %v576_v6  ;;  %v586_v21 = vld [vmem:[#allocation8 + $0x20] sm:$0xff]   ;;  %v587_v22 = vld [vmem:[#allocation8 + $0x18] sm:$0xff]   ;;  %v588_v23 = vld [vmem:[#allocation8 + $0x10] sm:$0xff]  }
  0x3b   :  { %501 = vmatprep.subr.bf16.mxu0 %v709_v0  ;;  %521 = vmatprep.subr.bf16.mxu1 %v709_v0  ;;  %v443_v24 = vld [vmem:[%s818_s2] ss:$0 sm:$0xff]  ;;  %v589_v33 = vld [vmem:[#allocation8 + $0x8] sm:$0xff]   ;;  %v590_v34 = vld [vmem:[#allocation8] sm:$0xff]  }
  0x3c   :  { %v452_v35 = vld [vmem:[%s820_s4] ss:$0 sm:$0xff]  ;;  %s712_s4 = smov [#allocation10]  }
  0x3d   :  { %v461_v43 = vld [vmem:[%s822_s6] ss:$0 sm:$0xff]  ;;  %s432_s24 = sshll.u32 %s712_s4, 4  ;;  %s433_s24 = int_to_ptr.vmem [resolvable:$true] %s432_s24 }
  0x3e   :  { %502 = vmatpush3.bf16.msra.mxu0 %v569_v3  ;;  %522 = vmatpush3.bf16.msra.mxu1 %v577_v8  ;;  %s675_s25 = scalar_lea.vmem %s433_s24, 128  ;;  %p680_p7 = scmp.lt.s32.totalorder %s433_s24, %s433_s24 }
  0x3f   :  { %503 = vmatprep.subr.bf16.mxu0 %v709_v0  ;;  %523 = vmatprep.subr.bf16.mxu1 %v709_v0  ;;  %p676_p6 = scmp.ne.s32.totalorder %s433_s24, %s675_s25  ;;  %p681_p8 = scmp.lt.s32.totalorder %s675_s25, %s675_s25 }
  0x41   :  { %p682_p9 = por %p681_p8, %p680_p7 }
  0x42   :  { %504 = vmatpush3.bf16.msra.mxu0 %v570_v5  ;;  %524 = vmatpush3.bf16.msra.mxu1 %v578_v10 }
  0x43   :  { %505 = vmatprep.subr.bf16.mxu0 %v709_v0  ;;  %525 = vmatprep.subr.bf16.mxu1 %v709_v0  ;;  %p683_p10 = pnand %p682_p9, %p676_p6 }
  0x46   :  { %506 = vmatpush3.bf16.msra.mxu0 %v571_v7  ;;  %526 = vmatpush3.bf16.msra.mxu1 %v579_v12 }
  0x47   :  { %507 = vmatprep.subr.bf16.mxu0 %v709_v0  ;;  %527 = vmatprep.subr.bf16.mxu1 %v709_v0 }
  0x4a   :  { %508 = vmatpush3.bf16.msra.mxu0 %v572_v9  ;;  %528 = vmatpush3.bf16.msra.mxu1 %v580_v14 }
  0x4b   :  { %509 = vmatprep.subr.bf16.mxu0 %v709_v0  ;;  %529 = vmatprep.subr.bf16.mxu1 %v709_v0 }
  0x4e   :  { %510 = vmatpush3.bf16.msra.mxu0 %v573_v11  ;;  %530 = vmatpush3.bf16.msra.mxu1 %v581_v16 }
  0x4f   :  { %511 = vmatprep.subr.bf16.mxu0 %v709_v0  ;;  %531 = vmatprep.subr.bf16.mxu1 %v709_v0 }
  0x52   :  { %512 = vmatpush3.bf16.msra.mxu0 %v574_v13  ;;  %532 = vmatpush3.bf16.msra.mxu1 %v582_v17 }
  0x53   :  { %537 = vmatprep.subr.bf16.mxu0 %v709_v0 }
  0x55   :  { %514 = vmatmul.mubr.bf16.vlgmr.msra.gmra.mxu0 %v81_v15 }
  0x56   :  { %553 = vmatprep.mubr.msk.bf16.mxu0 %vm710_vm0, %v709_v0  ;;  %538 = vmatpush3.bf16.msra.mxu0 %v583_v18 }
  0x57   :  { %539 = vmatprep.subr.bf16.mxu0 %v709_v0 }
  0x5a   :  { %540 = vmatpush3.bf16.msra.mxu0 %v584_v19 }
  0x5b   :  { %541 = vmatprep.subr.bf16.mxu0 %v709_v0 }
  0x5e   :  { %542 = vmatpush3.bf16.msra.mxu0 %v585_v20 }
  0x5f   :  { %543 = vmatprep.subr.bf16.mxu0 %v709_v0 }
  0x62   :  { %544 = vmatpush3.bf16.msra.mxu0 %v586_v21 }
  0x63   :  { %545 = vmatprep.subr.bf16.mxu0 %v709_v0 }
  0x66   :  { %546 = vmatpush3.bf16.msra.mxu0 %v587_v22 }
  0x67   :  { %547 = vmatprep.subr.bf16.mxu0 %v709_v0 }
  0x6a   :  { %548 = vmatpush3.bf16.msra.mxu0 %v588_v23 }
  0x6b   :  { %549 = vmatprep.subr.bf16.mxu0 %v709_v0 }
  0x6e   :  { %550 = vmatpush3.bf16.msra.mxu0 %v589_v33 }
  0x6f   :  { %551 = vmatprep.subr.bf16.mxu0 %v709_v0 }
  0x72   :  { %552 = vmatpush3.bf16.msra.mxu0 %v590_v34 }
 0x115   :  { %v187_v25 = vpop.f32.mrf.mxu0 }
 0x116   :  { %v188_v26 = vadd.f32 %v443_v24, %v187_v25 }
 0x117   :  { %v515_v27 = vpop.f32.mrf.mxu0 }
 0x118   :  { %v193_v28 = vpack.c.bf16 %v188_v26, %v188_v26 }
 0x119   :  { %v190_v29 = vpop.f32.mrf.mxu0 }
 0x11a   :  { %v194_v31 = vmax.bf16 %v711_v30, %v193_v28 }
 0x11b   :  { %v516_v32 = vpop.f32.mrf.mxu0 }
 0x11c   :  { %534 = vmatmul.mubr.bf16.vlgmr.msra.gmra.mxu1 %v194_v31 }
 0x1dc   :  { %v300_v36 = vpop.f32.mrf.mxu1 }
 0x1dd   :  { %v301_v37 = vadd.f32 %v452_v35, %v300_v36 }
 0x1de   :  { %v535_v38 = vpop.f32.mrf.mxu1 }
 0x1df   :  { %v306_v39 = vpack.c.bf16 %v301_v37, %v301_v37 }
 0x1e0   :  { %v303_v40 = vpop.f32.mrf.mxu1 }
 0x1e1   :  { %v307_v41 = vmax.bf16 %v711_v30, %v306_v39 }
 0x1e2   :  { %v536_v42 = vpop.f32.mrf.mxu1 }
 0x1e3   :  { %554 = vmatmul.mubr.bf16.vlgmr.msra.gmra.mxu0 %v307_v41 }
 0x2a3   :  { %v413_v44 = vpop.f32.mrf.mxu0 }
 0x2a4   :  { %v414_v45 = vadd.f32 %v461_v43, %v413_v44 }
 0x2a5   :  { %v555_v46 = vpop.f32.mrf.mxu0 }
 0x2a6   :  { %v419_v47 = vsub.f32 0.0, %v414_v45 }
 0x2a7   :  { %v416_v48 = vpop.f32.mrf.mxu0 }
 0x2a8   :  { %v420_v49 = vmul.f32 1.442695, %v419_v47 }
 0x2a9   :  { %v556_v50 = vpop.f32.mrf.mxu0 }
 0x2aa   :  { %591 = vpow2.f32 %v420_v49 }
 0x2b7   :  { %v592_v51 = vpop.eup %591 }
 0x2b8   :  { %v422_v52 = vadd.f32 1.0, %v592_v51 }
 0x2ba   :  { %593 = vrcp.f32 %v422_v52 }
 0x2c7   :  { %v594_v53 = vpop.eup %593 }
 0x2c8   :  { %425 = vst [vmem:[#allocation10] sm:$0xff] %v594_v53 }
 0x2c9   :  { %686 = shalt.err (!%p683_p10)
}
 0x2ca   :  { %435 = dma.vmem_to_hbm [thread:$0]  %s433_s24, 128, %s823_s7, [#allocation4]  }
 0x2cb   :  { %701 = dma.done.wait [#allocation4], 128  }
 0x2cc   :  { %702 = vsyncadd [#allocation4], 4294967168 }
 0x2cd   :  { %439 = vsyncpa [#allocation3], 1 }
 0x2ce   :  { %440 = vsyncpa [#allocation6], 1 }
 0x2cf   :  { %441 = vsyncpa [#allocation9], 1 }
 0x2d0   :  { %442 = vsyncpa [#allocation4], 1 }

// kernel: tpu_custom_call.1
= control target key start
LH: loop header
LB: loop body
LE: loop exit
PB: predicated region body
PF: predicated region fallthrough
CT: control target
= control target key end

     0   :  { %12 = vsyncpa [#allocation3], 0  ;;  %s816_s0 = inlined_call_operand.hbm [shape: bf16[8,128], index: 0, kind: input, shape index: {}]   ;;  %s817_s1 = inlined_call_operand.hbm [shape: bf16[128,128], index: 1, kind: input, shape index: {}]   ;;  %s818_s2 = inlined_call_operand.vmem [shape: f32[1,128], index: 2, kind: input, shape index: {}]   ;;  %s819_s3 = inlined_call_operand.hbm [shape: bf16[128,128], index: 3, kind: input, shape index: {}]   ;;  %s820_s4 = inlined_call_operand.vmem [shape: f32[1,128], index: 4, kind: input, shape index: {}]   ;;  %s821_s5 = inlined_call_operand.hbm [shape: bf16[128,128], index: 5, kind: input, shape index: {}]   ;;  %s822_s6 = inlined_call_operand.vmem [shape: f32[1,128], index: 6, kind: input, shape index: {}]   ;;  %s823_s7 = inlined_call_operand.hbm [shape: f32[8,128], index: 7, kind: output, shape index: {}]  }
   0x1   :  { %13 = vsyncpa [#allocation6], 0 }
   0x2   :  { %14 = vsyncpa [#allocation9], 0 }
   0x3   :  { %15 = vsyncpa [#allocation4], 0  ;;  %s703_s24 = smov [#allocation5]  }
   0x4   :  { %s31_s25 = sshll.u32 %s703_s24, 4  ;;  %s32_s25 = int_to_ptr.vmem [resolvable:$true] %s31_s25 }
   0x5   :  { %s603_s26 = scalar_lea.vmem %s32_s25, 1024  ;;  %p608_p1 = scmp.lt.s32.totalorder %s32_s25, %s32_s25 }
   0x6   :  { %p604_p0 = scmp.ne.s32.totalorder %s32_s25, %s603_s26  ;;  %p609_p2 = scmp.lt.s32.totalorder %s603_s26, %s603_s26 }
   0x8   :  { %p610_p3 = por %p609_p2, %p608_p1 }
   0xa   :  { %p611_p4 = pnand %p610_p3, %p604_p0 }
   0xc   :  { %614 = shalt.err (!%p611_p4)
}
   0xd   :  { %s704_s27 = smov 64   ;;  %s705_s28 = smov 4  }
   0xe   :  { %37 = dma.hbm_to_vmem [thread:$0]  %s817_s1, 1024, %s32_s25, [#allocation6], %s704_s27, %s704_s27, %s705_s28  }
   0xf   :  { %s706_s8 = smov [#allocation2]   ;;  %s707_s10 = smov [#allocation7]  }
  0x10   :  { %s22_s9 = sshll.u32 %s706_s8, 4  ;;  %s45_s11 = sshll.u32 %s707_s10, 4  ;;  %s23_s9 = int_to_ptr.vmem [resolvable:$true] %s22_s9  ;;  %s46_s11 = int_to_ptr.vmem [resolvable:$true] %s45_s11 }
  0x11   :  { %s623_s12 = scalar_lea.vmem %s23_s9, 64  ;;  %p628_p6 = scmp.lt.s32.totalorder %s23_s9, %s23_s9 }
  0x12   :  { %p624_p5 = scmp.ne.s32.totalorder %s23_s9, %s623_s12  ;;  %p629_p7 = scmp.lt.s32.totalorder %s623_s12, %s623_s12 }
  0x14   :  { %p630_p8 = por %p629_p7, %p628_p6 }
  0x16   :  { %p631_p9 = pnand %p630_p8, %p624_p5 }
  0x18   :  { %634 = shalt.err (!%p631_p9)
}
  0x19   :  { %25 = dma.hbm_to_vmem [thread:$0]  %s816_s0, 64, %s23_s9, [#allocation3]  }
  0x1a   :  { %s643_s15 = scalar_lea.vmem %s46_s11, 1024  ;;  %p648_p11 = scmp.lt.s32.totalorder %s46_s11, %s46_s11 }
  0x1b   :  { %p644_p10 = scmp.ne.s32.totalorder %s46_s11, %s643_s15  ;;  %p649_p12 = scmp.lt.s32.totalorder %s643_s15, %s643_s15 }
  0x1d   :  { %p650_p13 = por %p649_p12, %p648_p11 }
  0x1f   :  { %p651_p0 = pnand %p650_p13, %p644_p10 }
  0x21   :  { %654 = shalt.err (!%p651_p0)
}
  0x22   :  { %51 = dma.hbm_to_vmem [thread:$0]  %s819_s3, 1024, %s46_s11, [#allocation6], %s704_s27, %s704_s27, %s705_s28  }
  0x23   :  { %s708_s17 = smov [#allocation8]  }
  0x24   :  { %s59_s18 = sshll.u32 %s708_s17, 4  ;;  %s60_s18 = int_to_ptr.vmem [resolvable:$true] %s59_s18 }
  0x25   :  { %s663_s19 = scalar_lea.vmem %s60_s18, 1024  ;;  %p668_p2 = scmp.lt.s32.totalorder %s60_s18, %s60_s18 }
  0x26   :  { %p664_p1 = scmp.ne.s32.totalorder %s60_s18, %s663_s19  ;;  %p669_p3 = scmp.lt.s32.totalorder %s663_s19, %s663_s19 }
  0x28   :  { %p670_p4 = por %p669_p3, %p668_p2 }
  0x2a   :  { %p671_p5 = pnand %p670_p4, %p664_p1 }
  0x2c   :  { %674 = shalt.err (!%p671_p5)
}
  0x2d   :  { %65 = dma.hbm_to_vmem [thread:$0]  %s821_s5, 1024, %s60_s18, [#allocation9], %s704_s27, %s704_s27, %s705_s28  }
  0x2e   :  { %695 = dma.done.wait [#allocation3], 64  }
  0x2f   :  { %696 = vsyncadd [#allocation3], 4294967232 }
  0x30   :  { %697 = dma.done.wait [#allocation6], 2048  }
  0x31   :  { %698 = vsyncadd [#allocation6], 4294965248 }
  0x32   :  { %699 = dma.done.wait [#allocation9], 1024  }
  0x33   :  { %700 = vsyncadd [#allocation9], 4294966272  ;;  %v709_v0 = vmov 0.0   ;;  %vm710_vm0 = vmmov 0   ;;  %v567_v1 = vld [vmem:[#allocation5 + $0x38] sm:$0xff]   ;;  %v568_v2 = vld [vmem:[#allocation5 + $0x30] sm:$0xff]  }
  0x34   :  { %497 = vmatprep.subr.bf16.mxu0 %v709_v0  ;;  %513 = vmatprep.mubr.msk.bf16.mxu0 %vm710_vm0, %v709_v0  ;;  %v569_v3 = vld [vmem:[#allocation5 + $0x28] sm:$0xff]   ;;  %v575_v4 = vld [vmem:[#allocation7 + $0x38] sm:$0xff]   ;;  %v570_v5 = vld [vmem:[#allocation5 + $0x20] sm:$0xff]   ;;  %v711_v30 = vmov 0  }
  0x35   :  { %517 = vmatprep.subr.bf16.mxu1 %v709_v0  ;;  %533 = vmatprep.mubr.msk.bf16.mxu1 %vm710_vm0, %v709_v0  ;;  %v576_v6 = vld [vmem:[#allocation7 + $0x30] sm:$0xff]   ;;  %v571_v7 = vld [vmem:[#allocation5 + $0x18] sm:$0xff]   ;;  %v577_v8 = vld [vmem:[#allocation7 + $0x28] sm:$0xff]  }
  0x36   :  { %498 = vmatpush3.bf16.msra.mxu0 %v567_v1  ;;  %518 = vmatpush3.bf16.msra.mxu1 %v575_v4  ;;  %v572_v9 = vld [vmem:[#allocation5 + $0x10] sm:$0xff]   ;;  %v578_v10 = vld [vmem:[#allocation7 + $0x20] sm:$0xff]   ;;  %v573_v11 = vld [vmem:[#allocation5 + $0x8] sm:$0xff]  }
  0x37   :  { %499 = vmatprep.subr.bf16.mxu0 %v709_v0  ;;  %519 = vmatprep.subr.bf16.mxu1 %v709_v0  ;;  %v579_v12 = vld [vmem:[#allocation7 + $0x18] sm:$0xff]   ;;  %v574_v13 = vld [vmem:[#allocation5] sm:$0xff]   ;;  %v580_v14 = vld [vmem:[#allocation7 + $0x10] sm:$0xff]  }
  0x38   :  { %v81_v15 = vld [vmem:[#allocation2] sm:$0xf]  ;;  %v581_v16 = vld [vmem:[#allocation7 + $0x8] sm:$0xff]   ;;  %v582_v17 = vld [vmem:[#allocation7] sm:$0xff]  }
  0x39   :  { %v583_v18 = vld [vmem:[#allocation8 + $0x38] sm:$0xff]   ;;  %v584_v19 = vld [vmem:[#allocation8 + $0x30] sm:$0xff]   ;;  %v585_v20 = vld [vmem:[#allocation8 + $0x28] sm:$0xff]  }
  0x3a   :  { %500 = vmatpush3.bf16.msra.mxu0 %v568_v2  ;;  %520 = vmatpush3.bf16.msra.mxu1 %v576_v6  ;;  %v586_v21 = vld [vmem:[#allocation8 + $0x20] sm:$0xff]   ;;  %v587_v22 = vld [vmem:[#allocation8 + $0x18] sm:$0xff]   ;;  %v588_v23 = vld [vmem:[#allocation8 + $0x10] sm:$0xff]  }
  0x3b   :  { %501 = vmatprep.subr.bf16.mxu0 %v709_v0  ;;  %521 = vmatprep.subr.bf16.mxu1 %v709_v0  ;;  %v443_v24 = vld [vmem:[%s818_s2] ss:$0 sm:$0xff]  ;;  %v589_v33 = vld [vmem:[#allocation8 + $0x8] sm:$0xff]   ;;  %v590_v34 = vld [vmem:[#allocation8] sm:$0xff]  }
  0x3c   :  { %v452_v35 = vld [vmem:[%s820_s4] ss:$0 sm:$0xff]  ;;  %s712_s4 = smov [#allocation10]  }
  0x3d   :  { %v461_v43 = vld [vmem:[%s822_s6] ss:$0 sm:$0xff]  ;;  %s432_s24 = sshll.u32 %s712_s4, 4  ;;  %s433_s24 = int_to_ptr.vmem [resolvable:$true] %s432_s24 }
  0x3e   :  { %502 = vmatpush3.bf16.msra.mxu0 %v569_v3  ;;  %522 = vmatpush3.bf16.msra.mxu1 %v577_v8  ;;  %s675_s25 = scalar_lea.vmem %s433_s24, 128  ;;  %p680_p7 = scmp.lt.s32.totalorder %s433_s24, %s433_s24 }
  0x3f   :  { %503 = vmatprep.subr.bf16.mxu0 %v709_v0  ;;  %523 = vmatprep.subr.bf16.mxu1 %v709_v0  ;;  %p676_p6 = scmp.ne.s32.totalorder %s433_s24, %s675_s25  ;;  %p681_p8 = scmp.lt.s32.totalorder %s675_s25, %s675_s25 }
  0x41   :  { %p682_p9 = por %p681_p8, %p680_p7 }
  0x42   :  { %504 = vmatpush3.bf16.msra.mxu0 %v570_v5  ;;  %524 = vmatpush3.bf16.msra.mxu1 %v578_v10 }
  0x43   :  { %505 = vmatprep.subr.bf16.mxu0 %v709_v0  ;;  %525 = vmatprep.subr.bf16.mxu1 %v709_v0  ;;  %p683_p10 = pnand %p682_p9, %p676_p6 }
  0x46   :  { %506 = vmatpush3.bf16.msra.mxu0 %v571_v7  ;;  %526 = vmatpush3.bf16.msra.mxu1 %v579_v12 }
  0x47   :  { %507 = vmatprep.subr.bf16.mxu0 %v709_v0  ;;  %527 = vmatprep.subr.bf16.mxu1 %v709_v0 }
  0x4a   :  { %508 = vmatpush3.bf16.msra.mxu0 %v572_v9  ;;  %528 = vmatpush3.bf16.msra.mxu1 %v580_v14 }
  0x4b   :  { %509 = vmatprep.subr.bf16.mxu0 %v709_v0  ;;  %529 = vmatprep.subr.bf16.mxu1 %v709_v0 }
  0x4e   :  { %510 = vmatpush3.bf16.msra.mxu0 %v573_v11  ;;  %530 = vmatpush3.bf16.msra.mxu1 %v581_v16 }
  0x4f   :  { %511 = vmatprep.subr.bf16.mxu0 %v709_v0  ;;  %531 = vmatprep.subr.bf16.mxu1 %v709_v0 }
  0x52   :  { %512 = vmatpush3.bf16.msra.mxu0 %v574_v13  ;;  %532 = vmatpush3.bf16.msra.mxu1 %v582_v17 }
  0x53   :  { %537 = vmatprep.subr.bf16.mxu0 %v709_v0 }
  0x55   :  { %514 = vmatmul.mubr.bf16.vlgmr.msra.gmra.mxu0 %v81_v15 }
  0x56   :  { %553 = vmatprep.mubr.msk.bf16.mxu0 %vm710_vm0, %v709_v0  ;;  %538 = vmatpush3.bf16.msra.mxu0 %v583_v18 }
  0x57   :  { %539 = vmatprep.subr.bf16.mxu0 %v709_v0 }
  0x5a   :  { %540 = vmatpush3.bf16.msra.mxu0 %v584_v19 }
  0x5b   :  { %541 = vmatprep.subr.bf16.mxu0 %v709_v0 }
  0x5e   :  { %542 = vmatpush3.bf16.msra.mxu0 %v585_v20 }
  0x5f   :  { %543 = vmatprep.subr.bf16.mxu0 %v709_v0 }
  0x62   :  { %544 = vmatpush3.bf16.msra.mxu0 %v586_v21 }
  0x63   :  { %545 = vmatprep.subr.bf16.mxu0 %v709_v0 }
  0x66   :  { %546 = vmatpush3.bf16.msra.mxu0 %v587_v22 }
  0x67   :  { %547 = vmatprep.subr.bf16.mxu0 %v709_v0 }
  0x6a   :  { %548 = vmatpush3.bf16.msra.mxu0 %v588_v23 }
  0x6b   :  { %549 = vmatprep.subr.bf16.mxu0 %v709_v0 }
  0x6e   :  { %550 = vmatpush3.bf16.msra.mxu0 %v589_v33 }
  0x6f   :  { %551 = vmatprep.subr.bf16.mxu0 %v709_v0 }
  0x72   :  { %552 = vmatpush3.bf16.msra.mxu0 %v590_v34 }
 0x115   :  { %v187_v25 = vpop.f32.mrf.mxu0 }
 0x116   :  { %v188_v26 = vadd.f32 %v443_v24, %v187_v25 }
 0x117   :  { %v515_v27 = vpop.f32.mrf.mxu0 }
 0x118   :  { %v193_v28 = vpack.c.bf16 %v188_v26, %v188_v26 }
 0x119   :  { %v190_v29 = vpop.f32.mrf.mxu0 }
 0x11a   :  { %v194_v31 = vmax.bf16 %v711_v30, %v193_v28 }
 0x11b   :  { %v516_v32 = vpop.f32.mrf.mxu0 }
 0x11c   :  { %534 = vmatmul.mubr.bf16.vlgmr.msra.gmra.mxu1 %v194_v31 }
 0x1dc   :  { %v300_v36 = vpop.f32.mrf.mxu1 }
 0x1dd   :  { %v301_v37 = vadd.f32 %v452_v35, %v300_v36 }
 0x1de   :  { %v535_v38 = vpop.f32.mrf.mxu1 }
 0x1df   :  { %v306_v39 = vpack.c.bf16 %v301_v37, %v301_v37 }
 0x1e0   :  { %v303_v40 = vpop.f32.mrf.mxu1 }
 0x1e1   :  { %v307_v41 = vmax.bf16 %v711_v30, %v306_v39 }
 0x1e2   :  { %v536_v42 = vpop.f32.mrf.mxu1 }
 0x1e3   :  { %554 = vmatmul.mubr.bf16.vlgmr.msra.gmra.mxu0 %v307_v41 }
 0x2a3   :  { %v413_v44 = vpop.f32.mrf.mxu0 }
 0x2a4   :  { %v414_v45 = vadd.f32 %v461_v43, %v413_v44 }
 0x2a5   :  { %v555_v46 = vpop.f32.mrf.mxu0 }
 0x2a6   :  { %v419_v47 = vsub.f32 0.0, %v414_v45 }
 0x2a7   :  { %v416_v48 = vpop.f32.mrf.mxu0 }
 0x2a8   :  { %v420_v49 = vmul.f32 1.442695, %v419_v47 }
 0x2a9   :  { %v556_v50 = vpop.f32.mrf.mxu0 }
 0x2aa   :  { %591 = vpow2.f32 %v420_v49 }
 0x2b7   :  { %v592_v51 = vpop.eup %591 }
 0x2b8   :  { %v422_v52 = vadd.f32 1.0, %v592_v51 }
 0x2ba   :  { %593 = vrcp.f32 %v422_v52 }
 0x2c7   :  { %v594_v53 = vpop.eup %593 }
 0x2c8   :  { %425 = vst [vmem:[#allocation10] sm:$0xff] %v594_v53 }
 0x2c9   :  { %686 = shalt.err (!%p683_p10)
}
 0x2ca   :  { %435 = dma.vmem_to_hbm [thread:$0]  %s433_s24, 128, %s823_s7, [#allocation4]  }
 0x2cb   :  { %701 = dma.done.wait [#allocation4], 128  }
 0x2cc   :  { %702 = vsyncadd [#allocation4], 4294967168 }
 0x2cd   :  { %439 = vsyncpa [#allocation3], 1 }
 0x2ce   :  { %440 = vsyncpa [#allocation6], 1 }
 0x2cf   :  { %441 = vsyncpa [#allocation9], 1 }
 0x2d0   :  { %442 = vsyncpa [#allocation4], 1 }

</bundles_post_ra>
